<compile_context>
chip_gen: v7x
topology: tpu7x:2x2x1
jax: 0.10.0
libtpu: 0.0.40
codegen_flags: <defaults>
</compile_context>

<pallas_src>
import functools

import jax
import jax.numpy as jnp
from jax.experimental import pallas as pl
from jax.experimental.pallas import tpu as pltpu


def _round_up(v, m):
    return ((v + m - 1) // m) * m


def _pick_batch_tile(B, N, D, H, *, max_rows=2048, max_unroll=8,
                     vmem_budget=24 << 20):
    """Largest per-step batch count bt such that the double-buffered blocks fit
    the VMEM budget, rows stay MXU/M-friendly, and the static unroll stays small.
    Capped at B//2 so the grid keeps >=2 parallel steps (v7x: 2 TensorCores)."""
    weight_bytes = (D * H + H * H + 2 * H) * 4
    best = 1
    for bt in range(1, B + 1):
        rows = bt * N
        if rows > max_rows or bt > max_unroll:
            break
        step_bytes = (2 * (bt * N * N * 4)        # adj blocks (double-buffered)
                      + 2 * (rows * D * 4)        # x blocks
                      + 2 * (rows * H * 4)        # out blocks
                      + 2 * weight_bytes)
        if step_bytes > vmem_budget:
            break
        best = bt
    if B >= 2:
        best = min(best, max(1, B // 2))
    return best


def gin_kernel(eps_ref, x_ref, adj_ref, w1_ref, b1_ref, w2_ref, b2_ref, o_ref):
    eps = eps_ref[0, 0]                      # f32 scalar from SMEM
    bt, n, _ = adj_ref.shape                 # batches in this step, nodes/graph

    x = x_ref[...]                           # (bt*n, D) f32

    # Aggregation: per-batch adj @ x_b (f32 MXU, f32 accumulation), built as a
    # value and stacked along rows (n is a multiple of 8 → tile-aligned), then
    # the (1 + eps) * x residual add on the whole slab.
    parts = []
    for b in range(bt):                      # bt <= 8 (static unroll)
        xb = x[b * n:(b + 1) * n, :]
        parts.append(jnp.dot(adj_ref[b], xb, preferred_element_type=jnp.float32))
    agg = parts[0] if bt == 1 else jnp.concatenate(parts, axis=0)
    agg = agg + (1.0 + eps) * x              # (bt*n, D) f32

    # MLP: Linear -> ReLU -> Linear, all batches folded into the M dimension.
    h = jnp.dot(agg, w1_ref[...], preferred_element_type=jnp.float32) + b1_ref[...]
    h = jnp.maximum(h, 0.0)
    out = jnp.dot(h, w2_ref[...], preferred_element_type=jnp.float32) + b2_ref[...]

    o_ref[...] = out.astype(o_ref.dtype)     # (bt*n, H)


@functools.partial(jax.jit, static_argnums=())
def gin_layer(x, adj, eps, w1, b1, w2, b2):
    """x: (B, N, D), adj: (B, N, N), w1: (D, H), b1: (H,), w2: (H, H), b2: (H,)."""
    B, N, D = x.shape
    H = w1.shape[1]
    out_dtype = x.dtype

    # Sublane-align N (pad rows/cols with zeros: exact — padded adj rows/cols
    # are zero so they contribute nothing to real rows, and pad rows are sliced off).
    Np = _round_up(N, 8)
    bt = _pick_batch_tile(B, Np, D, H)
    Bp = pl.cdiv(B, bt) * bt
    if (Bp, Np) != (B, N):
        x = jnp.pad(x, ((0, Bp - B), (0, Np - N), (0, 0)))
        adj = jnp.pad(adj, ((0, Bp - B), (0, Np - N), (0, Np - N)))

    x2 = x.astype(jnp.float32).reshape(Bp * Np, D)   # free row-major reshape
    adj_f = adj.astype(jnp.float32)
    w1_f = w1.astype(jnp.float32)
    w2_f = w2.astype(jnp.float32)
    b1_f = b1.astype(jnp.float32).reshape(1, H)
    b2_f = b2.astype(jnp.float32).reshape(1, H)
    eps_arr = jnp.asarray(eps, jnp.float32).reshape(1, 1)

    grid = (Bp // bt,)

    out2 = pl.pallas_call(
        gin_kernel,
        out_shape=jax.ShapeDtypeStruct((Bp * Np, H), out_dtype),
        grid_spec=pltpu.PrefetchScalarGridSpec(
            num_scalar_prefetch=0,
            grid=grid,
            in_specs=[
                pl.BlockSpec(memory_space=pltpu.SMEM),            # eps (1,1)
                pl.BlockSpec((bt * Np, D), lambda i: (i, 0)),     # x rows
                pl.BlockSpec((bt, Np, Np), lambda i: (i, 0, 0)),  # adj
                pl.BlockSpec((D, H), lambda i: (0, 0)),           # w1
                pl.BlockSpec((1, H), lambda i: (0, 0)),           # b1
                pl.BlockSpec((H, H), lambda i: (0, 0)),           # w2
                pl.BlockSpec((1, H), lambda i: (0, 0)),           # b2
            ],
            out_specs=pl.BlockSpec((bt * Np, H), lambda i: (i, 0)),
        ),
        compiler_params=pltpu.CompilerParams(
            dimension_semantics=("parallel",),
            # Raise v5e's 16 MiB scoped default; stay under v7x's 64 MiB physical.
            vmem_limit_bytes=48 * 1024 * 1024,
        ),
    )(eps_arr, x2, adj_f, w1_f, b1_f, w2_f, b2_f)

    return out2.reshape(Bp, Np, H)[:B, :N, :]


def gin_layer_ref_f32(x, adj, eps, w1, b1, w2, b2):
    """Full-f32 reference (original module semantics)."""
    agg = jnp.einsum("bij,bjd->bid", adj, x,
                     preferred_element_type=jnp.float32) + (1.0 + eps) * x
    h = jnp.maximum(agg @ w1 + b1, 0.0)
    return h @ w2 + b2


if __name__ == "__main__":
    # Small shapes consistent with the module's forward:
    #   batch B=2, num nodes N=16, input_dim=32, hidden_dim=32
    B, N, D, H = 2, 16, 32, 32

    key = jax.random.PRNGKey(0)
    kx, kadj, kw1, kb1, kw2, kb2 = jax.random.split(key, 6)

    x = jax.random.normal(kx, (B, N, D), dtype=jnp.float32)
    adj = jax.random.uniform(kadj, (B, N, N), dtype=jnp.float32)

    # nn.Parameter eps initialized to 0 in PyTorch.
    eps = jnp.zeros((), dtype=jnp.float32)
    w1 = jax.random.normal(kw1, (D, H), dtype=jnp.float32) * 0.1
    b1 = jax.random.normal(kb1, (H,), dtype=jnp.float32) * 0.1
    w2 = jax.random.normal(kw2, (H, H), dtype=jnp.float32) * 0.1
    b2 = jax.random.normal(kb2, (H,), dtype=jnp.float32) * 0.1

    out = jax.block_until_ready(gin_layer(x, adj, eps, w1, b1, w2, b2))
    assert out.shape == (B, N, H), out.shape

    ref = gin_layer_ref_f32(x, adj, eps, w1, b1, w2, b2)
    assert jnp.allclose(out, ref, atol=2e-2, rtol=1e-2), float(
        jnp.max(jnp.abs(out - ref)))

    print("KERNEL_OK")
</pallas_src>

<mosaic_0001>
module attributes {stable_mosaic.version = 11 : i64} {
  func.func @gin_kernel(%arg0: i32, %arg1: memref<1x1xf32, #tpu.memory_space<smem>>, %arg2: memref<16x32xf32, #tpu.memory_space<vmem>>, %arg3: memref<1x16x16xf32, #tpu.memory_space<vmem>>, %arg4: memref<32x32xf32, #tpu.memory_space<vmem>>, %arg5: memref<1x32xf32, #tpu.memory_space<vmem>>, %arg6: memref<32x32xf32, #tpu.memory_space<vmem>>, %arg7: memref<1x32xf32, #tpu.memory_space<vmem>>, %arg8: memref<16x32xf32, #tpu.memory_space<vmem>>) attributes {dimension_semantics = [#tpu.dimension_semantics<parallel>], iteration_bounds = array<i64: 2>, scalar_prefetch = 0 : i64, scratch_operands = 0 : i64, tpu.core_type = #tpu.core_type<tc>, window_params = [{transform_indices = @transform_0, window_bounds = array<i64: 1, 1>}, {transform_indices = @transform_1, window_bounds = array<i64: 16, 32>}, {transform_indices = @transform_2, window_bounds = array<i64: 1, 16, 16>}, {pipeline_mode = #tpu.pipeline_mode<synchronous>, transform_indices = @transform_3, window_bounds = array<i64: 32, 32>}, {pipeline_mode = #tpu.pipeline_mode<synchronous>, transform_indices = @transform_4, window_bounds = array<i64: 1, 32>}, {pipeline_mode = #tpu.pipeline_mode<synchronous>, transform_indices = @transform_5, window_bounds = array<i64: 32, 32>}, {pipeline_mode = #tpu.pipeline_mode<synchronous>, transform_indices = @transform_6, window_bounds = array<i64: 1, 32>}, {transform_indices = @transform_7, window_bounds = array<i64: 16, 32>}]} {
    %c0 = arith.constant 0 : index
    %c0_0 = arith.constant 0 : index
    %0 = memref.load %arg1[%c0, %c0_0] : memref<1x1xf32, #tpu.memory_space<smem>>
    %c0_1 = arith.constant 0 : index
    %c0_2 = arith.constant 0 : index
    %1 = vector.load %arg2[%c0_1, %c0_2] : memref<16x32xf32, #tpu.memory_space<vmem>>, vector<16x32xf32>
    %c0_3 = arith.constant 0 : index
    %c0_4 = arith.constant 0 : index
    %c0_5 = arith.constant 0 : index
    %2 = vector.load %arg3[%c0_3, %c0_4, %c0_5] : memref<1x16x16xf32, #tpu.memory_space<vmem>>, vector<1x16x16xf32>
    %3 = vector.shape_cast %2 : vector<1x16x16xf32> to vector<16x16xf32>
    %cst = arith.constant dense<0.000000e+00> : vector<16x32xf32>
    %4 = tpu.matmul %3, %1, %cst {dimension_numbers = #tpu.dot_dimension_numbers<[1], [0], [0], [1], [0, 0, 1, 1], [], []>} : vector<16x16xf32>, vector<16x32xf32>, vector<16x32xf32> -> vector<16x32xf32>
    %cst_6 = arith.constant 1.000000e+00 : f32
    %5 = arith.addf %cst_6, %0 : f32
    %6 = vector.broadcast %5 : f32 to vector<16x32xf32>
    %7 = arith.mulf %6, %1 : vector<16x32xf32>
    %8 = arith.addf %4, %7 : vector<16x32xf32>
    %c0_7 = arith.constant 0 : index
    %c0_8 = arith.constant 0 : index
    %9 = vector.load %arg4[%c0_7, %c0_8] : memref<32x32xf32, #tpu.memory_space<vmem>>, vector<32x32xf32>
    %cst_9 = arith.constant dense<0.000000e+00> : vector<16x32xf32>
    %10 = tpu.matmul %8, %9, %cst_9 {dimension_numbers = #tpu.dot_dimension_numbers<[1], [0], [0], [1], [0, 0, 1, 1], [], []>} : vector<16x32xf32>, vector<32x32xf32>, vector<16x32xf32> -> vector<16x32xf32>
    %c0_10 = arith.constant 0 : index
    %c0_11 = arith.constant 0 : index
    %11 = vector.load %arg5[%c0_10, %c0_11] : memref<1x32xf32, #tpu.memory_space<vmem>>, vector<1x32xf32>
    %12 = vector.broadcast %11 : vector<1x32xf32> to vector<16x32xf32>
    %13 = arith.addf %10, %12 : vector<16x32xf32>
    %cst_12 = arith.constant 0.000000e+00 : f32
    %14 = vector.broadcast %cst_12 : f32 to vector<16x32xf32>
    %15 = arith.maximumf %13, %14 : vector<16x32xf32>
    %c0_13 = arith.constant 0 : index
    %c0_14 = arith.constant 0 : index
    %16 = vector.load %arg6[%c0_13, %c0_14] : memref<32x32xf32, #tpu.memory_space<vmem>>, vector<32x32xf32>
    %cst_15 = arith.constant dense<0.000000e+00> : vector<16x32xf32>
    %17 = tpu.matmul %15, %16, %cst_15 {dimension_numbers = #tpu.dot_dimension_numbers<[1], [0], [0], [1], [0, 0, 1, 1], [], []>} : vector<16x32xf32>, vector<32x32xf32>, vector<16x32xf32> -> vector<16x32xf32>
    %c0_16 = arith.constant 0 : index
    %c0_17 = arith.constant 0 : index
    %18 = vector.load %arg7[%c0_16, %c0_17] : memref<1x32xf32, #tpu.memory_space<vmem>>, vector<1x32xf32>
    %19 = vector.broadcast %18 : vector<1x32xf32> to vector<16x32xf32>
    %20 = arith.addf %17, %19 : vector<16x32xf32>
    %c0_18 = arith.constant 0 : index
    %c0_19 = arith.constant 0 : index
    %21 = vector.load %arg8[%c0_18, %c0_19] : memref<16x32xf32, #tpu.memory_space<vmem>>, vector<16x32xf32>
    tpu.vector_store %arg8[%c0_18, %c0_19], %20 {strides = array<i32>} : memref<16x32xf32, #tpu.memory_space<vmem>>, vector<16x32xf32>,
    return
  }
  func.func @transform_0(%arg0: i32) -> (i32, i32) {
    %c0_i32 = arith.constant 0 : i32
    %c0_i32_0 = arith.constant 0 : i32
    %c0_i32_1 = arith.constant 0 : i32
    return %c0_i32, %c0_i32_0 : i32, i32
  }
  func.func @transform_1(%arg0: i32) -> (i32, i32) {
    %c0_i32 = arith.constant 0 : i32
    %c0_i32_0 = arith.constant 0 : i32
    return %arg0, %c0_i32 : i32, i32
  }
  func.func @transform_2(%arg0: i32) -> (i32, i32, i32) {
    %c0_i32 = arith.constant 0 : i32
    %c0_i32_0 = arith.constant 0 : i32
    %c0_i32_1 = arith.constant 0 : i32
    return %arg0, %c0_i32, %c0_i32_0 : i32, i32, i32
  }
  func.func @transform_3(%arg0: i32) -> (i32, i32) {
    %c0_i32 = arith.constant 0 : i32
    %c0_i32_0 = arith.constant 0 : i32
    %c0_i32_1 = arith.constant 0 : i32
    return %c0_i32, %c0_i32_0 : i32, i32
  }
  func.func @transform_4(%arg0: i32) -> (i32, i32) {
    %c0_i32 = arith.constant 0 : i32
    %c0_i32_0 = arith.constant 0 : i32
    %c0_i32_1 = arith.constant 0 : i32
    return %c0_i32, %c0_i32_0 : i32, i32
  }
  func.func @transform_5(%arg0: i32) -> (i32, i32) {
    %c0_i32 = arith.constant 0 : i32
    %c0_i32_0 = arith.constant 0 : i32
    %c0_i32_1 = arith.constant 0 : i32
    return %c0_i32, %c0_i32_0 : i32, i32
  }
  func.func @transform_6(%arg0: i32) -> (i32, i32) {
    %c0_i32 = arith.constant 0 : i32
    %c0_i32_0 = arith.constant 0 : i32
    %c0_i32_1 = arith.constant 0 : i32
    return %c0_i32, %c0_i32_0 : i32, i32
  }
  func.func @transform_7(%arg0: i32) -> (i32, i32) {
    %c0_i32 = arith.constant 0 : i32
    %c0_i32_0 = arith.constant 0 : i32
    return %arg0, %c0_i32 : i32, i32
  }
}

</mosaic_0001>

<bundles_post_ra>
// kernel: gin_layer.1
= control target key start
LH: loop header
LB: loop body
LE: loop exit
PB: predicated region body
PF: predicated region fallthrough
CT: control target
= control target key end

     0   :  { %s1412_s0 = inlined_call_operand.<no memory space> [shape: f32[1,1], index: 0, kind: input, shape index: {}]   ;;  %s1413_s1 = inlined_call_operand.hbm [shape: f32[32,32], index: 1, kind: input, shape index: {}]   ;;  %s1414_s2 = inlined_call_operand.hbm [shape: f32[2,16,16], index: 2, kind: input, shape index: {}]   ;;  %s1415_s3 = inlined_call_operand.hbm [shape: f32[32,32], index: 3, kind: input, shape index: {}]   ;;  %s1416_s4 = inlined_call_operand.vmem [shape: f32[1,32], index: 4, kind: input, shape index: {}]   ;;  %s1417_s5 = inlined_call_operand.vmem [shape: f32[32,32], index: 5, kind: input, shape index: {}]   ;;  %s1418_s6 = inlined_call_operand.vmem [shape: f32[1,32], index: 6, kind: input, shape index: {}]   ;;  %s1419_s7 = inlined_call_operand.hbm [shape: f32[32,32], index: 7, kind: output, shape index: {}]  }
   0x1   :  { %1430 = sst [smem:[#allocation17_spill]] %s1413_s1 }
   0x2   :  { %1431 = sst [smem:[#allocation18_spill]] %s1415_s3 }
   0x3   :  { %12 = sst [smem:[#allocation2]] %s1412_s0 }
   0x4   :  { %13 = vsyncpa [#allocation4], 0 }
   0x5   :  { %15 = vsyncpa [#allocation4 + $0x1], 0 }
   0x6   :  { %16 = vsyncpa [#allocation7], 0 }
   0x7   :  { %18 = vsyncpa [#allocation7 + $0x1], 0 }
   0x8   :  { %19 = vsyncpa [#allocation5], 0 }
   0x9   :  { %21 = vsyncpa [#allocation5 + $0x1], 0  ;;  %s1130_s26 = smov 0   ;;  %s1132_s27 = smov 0  }
   0xa   :  { %s1134_s28 = smov 0   ;;  %s1136_s29 = smov 0  }
   0xb LB: > { %1432 = sst [smem:[#allocation14_spill]] %s1073_s28  ;;  %s1151_s0 = sadd.s32 4294967295, %s1077_s29   ;;  %s1077_s29 = sphi %s1136_s29, %s1452_s29   ;;  %s1073_s28 = sphi %s1134_s28, %s1454_s28   ;;  %s1069_s27 = sphi %s1132_s27, %s1456_s27   ;;  %s1065_s26 = sphi %s1130_s26, %s1455_s26  }
   0xc   : > { %s753_s30 = sadd.s32 4294967294, %s1077_s29   ;;  %p68_p0 = scmp.ne.s32.totalorder %s1069_s27, %s1065_s26 }
   0xd   : > { %p1420_p1 = scmp.eq.s32.totalorder %s1151_s0, 0  ;;  %p208_p3 = scmp.eq.s32.totalorder %s753_s30, 1 }
   0xe   : > { %p754_p5 = scmp.ge.s32.totalorder %s1077_s29, 1  ;;  %p215_p7 = scmp.lt.s32.totalorder %s1077_s29, 3 }
   0xf   : > { %p1160_p4 = por %p1420_p1, %p68_p0  ;;  %p1165_p6 = por %p208_p3, %p68_p0 }
  0x10   : > { %p1170_p8 = pnand %p754_p5, %p215_p7  ;;  %s1079_s11 = smov [#allocation8]  }
  0x11   : > { %s1433_s8 = scalar_select %p1160_p4, 1, 0 }
  0x12   : > { %s1434_s9 = scalar_select %p1165_p6, 1, 0 }
  0x13   : > { %s1435_s10 = scalar_select %p1170_p8, 1, 0 }
  0x14   : > { %s230_s12 = sshll.u32 %s1079_s11, 4  ;;  %p859_p9 = pneg %p1170_p8  ;;  %s1174_s12 = int_to_ptr.vmem [resolvable:$true] %s230_s12 }
  0x15   : > { %s1186_s14 = sadd.s32 1, %s1077_s29   ;;  %s55_s15 = sadd.s32 1, %s1073_s28 }
  0x16   : > { %p1181_p11 = pnand %p859_p9, %p1420_p1  ;;  %1437 = sst [smem:[#allocation15_spill]] %s1186_s14 }
  0x17   : > { %s52_s16 = ssub.s32 %s1077_s29, %s1186_s14  ;;  %s1438_s3 = sld [smem:[#allocation18_spill]] }
  0x18   : > { %p917_p13 = pneg %p1181_p11 }
  0x1d   : > { %s915_s19 = scalar_lea.hbm %s1438_s3, 512 }
  0x1e   : > { %p916_p12 = scmp.ne.s32.totalorder %s1438_s3, %s915_s19  ;;  %p922_p5 = scmp.lt.u32.totalorder %s915_s19, %s1438_s3 }
  0x20   : > { %p918_p0 = pnand %p917_p13, %p916_p12 }
  0x22   : > { %p919_p3 = pneg %p918_p0 }
  0x24   : > { %p924_p7 = pnand %p922_p5, %p919_p3 }
  0x26   : > { %927 = shalt.err (!%p924_p7)
}
  0x27   : > { %s928_s24 = scalar_lea.vmem %s1174_s12, 512  ;;  %p936_p2 = scmp.lt.s32.totalorder %s1174_s12, %s1174_s12 }
  0x28   : > { %p929_p9 = scmp.ne.s32.totalorder %s1174_s12, %s928_s24  ;;  %p937_p6 = scmp.lt.s32.totalorder %s928_s24, %s928_s24 }
  0x2a   : > { %p931_p10 = pnand %p929_p9, %p917_p13  ;;  %p938_p4 = por %p937_p6, %p936_p2 }
  0x2c   : > { %p932_p1 = pneg %p931_p10 }
  0x2e   : > { %p939_p8 = pnand %p938_p4, %p932_p1 }
  0x30   : > { %942 = shalt.err (!%p939_p8)
}
  0x31   : > { %s1423_s25 = smov 128   ;;  %s1425_s30 = smov 8  }
  0x32   : > { %862 = dma.hbm_to_vmem [thread:$0]  (!%p1181_p11), %s1438_s3, 512, %s1174_s12, [#allocation7], %s1423_s25, %s1423_s25, %s1425_s30  }
  0x33   : > { %p53_p1 = scmp.eq.s32.totalorder %s52_s16, 0  ;;  %p62_p2 = scmp.ne.s32.totalorder %s1073_s28, %s1069_s27 }
  0x34   : > { %p63_p4 = scmp.eq.s32.totalorder %s1077_s29, 0  ;;  %p875_p6 = scmp.lt.s32.totalorder %s1077_s29, 2 }
  0x35   : > { %s1220_s18 = scalar_select %p53_p1, %s1073_s28, %s55_s15  }
  0x36   : > { %p64_p8 = por %p63_p4, %p62_p2  ;;  %p1440_p10 = scmp.eq.s32.totalorder %s1151_s0, 1 }
  0x37   : > { %1439 = sst [smem:[#allocation16_spill]] %s1220_s18  ;;  %s253_s13 = sand.u32 1, %s1073_s28  }
  0x38   : > { %p1224_p12 = por %p1440_p10, %p62_p2  ;;  %s781_s20 = sshll.u32 %s1077_s29, 8 }
  0x39   : > { %s1230_s21 = sshll.u32 %s253_s13, 4  ;;  %s1442_s1 = sld [smem:[#allocation17_spill]] }
  0x3a   : > { %s257_s15 = scalar_lea.vmem [#allocation3], %s1230_s21  ;;  %p1238_p11 = pnand %p875_p6, %p64_p8 }
  0x3b   : > { %s264_s16 = sshll.u32 %s257_s15, 4  ;;  %s1247_s22 = scalar_lea.hbm %s1414_s2, %s781_s20  ;;  %s1242_s16 = int_to_ptr.vmem [resolvable:$true] %s264_s16 }
  0x3c   : > { %s1249_s23 = scalar_lea.sflag [#allocation4], %s253_s13  ;;  %p945_p0 = pneg %p1238_p11 }
  0x3f   : > { %s1235_s12 = scalar_lea.hbm %s1442_s1, %s781_s20  ;;  %s948_s3 = scalar_lea.hbm %s1442_s1, 512 }
  0x40   : > { %s943_s25 = scalar_lea.hbm %s1235_s12, 256  ;;  %p949_p7 = scmp.lt.u32.totalorder %s1235_s12, %s1442_s1 }
  0x41   : > { %p944_p13 = scmp.ne.s32.totalorder %s1235_s12, %s943_s25  ;;  %p950_p9 = scmp.lt.u32.totalorder %s948_s3, %s943_s25 }
  0x42   : > { %p952_p2 = scmp.lt.u32.totalorder %s943_s25, %s1235_s12 }
  0x43   : > { %p946_p3 = pnand %p945_p0, %p944_p13  ;;  %p951_p1 = por %p950_p9, %p949_p7 }
  0x45   : > { %p947_p5 = pneg %p946_p3  ;;  %p953_p4 = por %p952_p2, %p951_p1 }
  0x47   : > { %p954_p6 = pnand %p953_p4, %p947_p5 }
  0x49   : > { %957 = shalt.err (!%p954_p6)
}
  0x4a   : > { %s958_s13 = scalar_lea.vmem %s1242_s16, 256  ;;  %s1082_s30 = smov [#allocation3]  }
  0x4b   : > { %p959_p8 = scmp.ne.s32.totalorder %s1242_s16, %s958_s13  ;;  %s963_s20 = sshll.u32 %s1082_s30, 4  ;;  %s964_s20 = int_to_ptr.vmem [resolvable:$false] %s963_s20 }
  0x4c   : > { %s965_s28 = scalar_lea.vmem %s964_s20, 512  ;;  %p966_p3 = scmp.lt.s32.totalorder %s1242_s16, %s964_s20 }
  0x4d   : > { %p961_p10 = pnand %p959_p8, %p945_p0  ;;  %p967_p7 = scmp.lt.s32.totalorder %s965_s28, %s958_s13 }
  0x4f   : > { %p962_p13 = pneg %p961_p10  ;;  %p968_p9 = por %p967_p7, %p966_p3 }
  0x51   : > { %p969_p1 = pnand %p968_p9, %p962_p13 }
  0x53   : > { %972 = shalt.err (!%p969_p1)
}
  0x54   : > { %s1444_s3 = smov 8   ;;  %s1445_s25 = smov 128  }
  0x55   : > { %866 = dma.hbm_to_vmem [thread:$0]  (!%p1238_p11), %s1235_s12, 256, %s1242_s16, %s1249_s23, %s1445_s25, %s1445_s25, %s1444_s3  }
  0x56   : > { %s278_s18 = scalar_lea.vmem [#allocation6], %s1230_s21  ;;  %s274_s17 = sand.u32 1, %s1077_s29  }
  0x57   : > { %s285_s11 = sshll.u32 %s278_s18, 4  ;;  %s1284_s15 = scalar_lea.sflag [#allocation7], %s274_s17  ;;  %s1282_s11 = int_to_ptr.vmem [resolvable:$true] %s285_s11 }
  0x58   : > { %s973_s13 = scalar_lea.hbm %s1247_s22, 256  ;;  %s978_s28 = scalar_lea.hbm %s1414_s2, 512 }
  0x59   : > { %p974_p5 = scmp.ne.s32.totalorder %s1247_s22, %s973_s13  ;;  %p979_p6 = scmp.lt.u32.totalorder %s1247_s22, %s1414_s2 }
  0x5a   : > { %p980_p8 = scmp.lt.u32.totalorder %s978_s28, %s973_s13  ;;  %p982_p13 = scmp.lt.u32.totalorder %s973_s13, %s1247_s22 }
  0x5b   : > { %p976_p2 = pnand %p974_p5, %p945_p0 }
  0x5c   : > { %p981_p10 = por %p980_p8, %p979_p6 }
  0x5d   : > { %p977_p4 = pneg %p976_p2 }
  0x5e   : > { %p983_p3 = por %p982_p13, %p981_p10 }
  0x60   : > { %p984_p7 = pnand %p983_p3, %p977_p4 }
  0x62   : > { %987 = shalt.err (!%p984_p7)
}
  0x63   : > { %s988_s21 = scalar_lea.vmem %s1282_s11, 256  ;;  %s1083_s12 = smov [#allocation6]  }
  0x64   : > { %p989_p9 = scmp.ne.s32.totalorder %s1282_s11, %s988_s21  ;;  %s993_s16 = sshll.u32 %s1083_s12, 4  ;;  %s994_s16 = int_to_ptr.vmem [resolvable:$false] %s993_s16 }
  0x65   : > { %s995_s1 = scalar_lea.vmem %s994_s16, 512  ;;  %p996_p2 = scmp.lt.s32.totalorder %s1282_s11, %s994_s16 }
  0x66   : > { %p991_p1 = pnand %p989_p9, %p945_p0  ;;  %p997_p6 = scmp.lt.s32.totalorder %s995_s1, %s988_s21 }
  0x68   : > { %p992_p5 = pneg %p991_p1  ;;  %p998_p8 = por %p997_p6, %p996_p2 }
  0x6a   : > { %p999_p10 = pnand %p998_p8, %p992_p5 }
  0x6c   : > { %1002 = shalt.err (!%p999_p10)
}
  0x6d   : > { %869 = dma.hbm_to_vmem [thread:$0]  (!%p1238_p11), %s1247_s22, 256, %s1282_s11, %s1284_s15, %s1445_s25, %s1445_s25, %s1444_s3  }
  0x6e   : > { %p1446_p0 = scmp.ne.s32.totalorder %s1435_s10, 0 }
  0x6f   : > { %s1316_s14 = sand.u32 (!%p1446_p0), 1, %s1069_s27   ;;  %p1447_p4 = scmp.ne.s32.totalorder (!%p1446_p0), %s1433_s8, 0 }
  0x70   : > { %297 = sbr.rel (%p1446_p0) target bundleno = 797 (0x31d), region = 48  ;;  %s1319_s23 = sshll.u32 (!%p1446_p0), %s1316_s14, 4 }
  0x71   : > { %s300_s24 = scalar_lea.sflag (!%p1446_p0), [#allocation4], %s1316_s14  ;;  %s303_s18 = scalar_lea.vmem (!%p1446_p0), [#allocation3], %s1319_s23 }
  0x77   : > { %1048 = dma.done.wait (%p1447_p4), %s300_s24, 256  }
  0x78   : > { %1050 = vsyncadd (%p1447_p4), %s300_s24, 4294967040  ;;  %s308_s10 = sand.u32 1, %s1151_s0   ;;  %s312_s3 = scalar_lea.vmem [#allocation6], %s1319_s23 }
  0x79   : > { %s309_s22 = scalar_lea.sflag [#allocation7], %s308_s10 }
  0x7a   : > { %1052 = dma.done.wait (%p1447_p4), %s309_s22, 256  }
  0x7b   : > { %1054 = vsyncadd (%p1447_p4), %s309_s22, 4294967040  ;;  %p1448_p11 = scmp.eq.s32.totalorder %s1151_s0, 0 }
  0x7d   : > { %1056 = dma.done.wait (%p1448_p11), [#allocation7], 512   ;;  %p1449_p13 = pmov %p1448_p11 }
  0x7e   : > { %vm363_vm0 = vcmask 130048   ;;  %v355_v0 = vld [vmem:[%s303_s18] sm:$0xff]  ;;  %v356_v1 = vld [vmem:[%s303_s18 + $0x8] sm:$0xff]  ;;  %s354_s15 = sld [smem:[#allocation2]]  ;;  %vm456_vm1 = vcmask 261120   ;;  %s351_s1 = scalar_lea.vmem [#allocation9], %s1319_s23 }
  0x7f   : > { %1058 = vsyncadd (%p1449_p13), [#allocation7], 4294966784  ;;  %v357_v2 = vld [vmem:[%s312_s3] sm:$0xff]  ;;  %v829_v3 = vpack.c.bf16 %v356_v1, %v355_v0  ;;  %v446_v5 = vld [vmem:[#allocation8 + $0x8] sm:$0xff]  ;;  %s648_s24 = sshll.u32 %s351_s1, 4  ;;  %s783_s22 = sshll.u32 %s1151_s0, 8  ;;  %s1361_s24 = int_to_ptr.vmem [resolvable:$true] %s648_s24 }
  0x80   : > { %804 = vmatprep.mubr.msk.f32.mxu0 %vm363_vm0, %v357_v2  ;;  %v445_v4 = vld [vmem:[#allocation8] sm:$0xff]  ;;  %v358_v7 = vld [vmem:[%s312_s3 + $0x8] sm:$0xff]  ;;  %v447_v8 = vld [vmem:[#allocation8 + $0x10] sm:$0xff]  ;;  %s1366_s25 = scalar_lea.hbm %s1419_s7, %s783_s22  ;;  %s635_s23 = scalar_lea.sflag [#allocation5], %s1316_s14 }
  0x81   : > { %v833_v6 = vpack.c.bf16 %v446_v5, %v445_v4  ;;  %830 = vmatprep.subr.bf16.mxu0 %v829_v3  ;;  %v448_v9 = vld [vmem:[#allocation8 + $0x18] sm:$0xff]  ;;  %v540_v11 = vld [vmem:[%s1417_s5] sm:$0xff]  ;;  %v541_v12 = vld [vmem:[%s1417_s5 + $0x8] sm:$0xff]  ;;  %s1003_s0 = scalar_lea.vmem %s1361_s24, 256  ;;  %s1084_s11 = smov [#allocation9]  }
  0x82   : > { %832 = vmatpush3.bf16.msra.mxu0 %v829_v3  ;;  %v837_v10 = vpack.c.bf16 %v448_v9, %v447_v8  ;;  %v841_v13 = vpack.c.bf16 %v541_v12, %v540_v11  ;;  %v542_v21 = vld [vmem:[%s1417_s5 + $0x10] sm:$0xff]  ;;  %v543_v22 = vld [vmem:[%s1417_s5 + $0x18] sm:$0xff]  ;;  %v770_v24 = vld [vmem:[%s1416_s4] ss:$0 sm:$0xff]  ;;  %p1004_p3 = scmp.ne.s32.totalorder %s1361_s24, %s1003_s0  ;;  %s1007_s17 = sshll.u32 %s1084_s11, 4  ;;  %s1008_s17 = int_to_ptr.vmem [resolvable:$false] %s1007_s17 }
  0x83   : > { %834 = vmatprep.subr.bf16.mxu1 %v833_v6  ;;  %v845_v23 = vpack.c.bf16 %v543_v22, %v542_v21  ;;  %v773_v31 = vld [vmem:[%s1418_s6] ss:$0 sm:$0xff]  ;;  %p1010_p1 = scmp.lt.s32.totalorder %s1361_s24, %s1008_s17 }
  0x84   : > { %836 = vmatpush3.bf16.msra.mxu1 %v833_v6  ;;  %842 = vmatprep.subr.bf16.mxu0 %v841_v13  ;;  %s359_s13 = sadd.f32 1.0, %s354_s15  ;;  %p1005_p7 = pnand %p1004_p3, %p1224_p12 }
  0x85   : > { %805 = vmatmul.mubr.msk.f32.vlgmr.msra.gmra.mrb[0].mxu0 %vm363_vm0, %v358_v7  ;;  %838 = vmatprep.subr.bf16.mxu1 %v837_v10  ;;  %s1009_s15 = scalar_lea.vmem %s1008_s17, 512 }
  0x86   : > { %844 = vmatpush3.bf16.msra.mxu0 %v841_v13  ;;  %v360_v14 = vstv %s359_s13  ;;  %p1006_p9 = pneg %p1005_p7  ;;  %p1011_p5 = scmp.lt.s32.totalorder %s1009_s15, %s1003_s0 }
  0x87   : > { %v362_v15 = vmul.f32 %v360_v14, %v356_v1  ;;  %v361_v16 = vmul.f32 %v360_v14, %v355_v0  ;;  %846 = vmatprep.subr.bf16.mxu0 %v845_v23 }
  0x88   : > { %840 = vmatpush3.bf16.msra.mxu1 %v837_v10  ;;  %p1012_p2 = por %p1011_p5, %p1010_p1 }
  0x8a   : > { %848 = vmatpush3.bf16.msra.mxu0 %v845_v23  ;;  %p1013_p6 = pnand %p1012_p2, %p1006_p9 }
 0x158   : > { %v806_v17 = vpop.f32.mrb[0].mxu0 }
 0x159   : > { %v442_v18 = vadd.f32 %v806_v17, %v362_v15  ;;  %v436_v19 = vpop.f32.mrb[1].mxu0 }
 0x15a   : > { %v437_v20 = vadd.f32 %v436_v19, %v361_v16 }
 0x15c   : > { %815 = vmatprep.mubr.msk.f32.mxu1 %vm456_vm1, %v437_v20 }
 0x15d   : > { %816 = vmatmul.mubr.msk.f32.vlgmr.msra.gmra.mrb[0].mxu1 %vm456_vm1, %v442_v18 }
 0x230   : > { %v817_v25 = vpop.f32.mrb[0].mxu1 }
 0x231   : > { %v535_v26 = vadd.f32 %v817_v25, %v770_v24  ;;  %v529_v27 = vpop.f32.mrb[1].mxu1 }
 0x232   : > { %v530_v28 = vadd.f32 %v770_v24, %v529_v27 }
 0x233   : > { %v539_v30 = vmax.f32 %v535_v26, 0.0 }
 0x234   : > { %v538_v29 = vmax.f32 %v530_v28, 0.0 }
 0x236   : > { %826 = vmatprep.mubr.msk.f32.mxu0 %vm456_vm1, %v538_v29 }
 0x237   : > { %827 = vmatmul.mubr.msk.f32.vlgmr.msra.gmra.mrb[2].mxu0 %vm456_vm1, %v539_v30 }
 0x30a   : > { %v828_v32 = vpop.f32.mrb[2].mxu0 }
 0x30b   : > { %v629_v33 = vadd.f32 %v828_v32, %v773_v31  ;;  %v623_v34 = vpop.f32.mrb[3].mxu0 }
 0x30c   : > { %v624_v35 = vadd.f32 %v773_v31, %v623_v34 }
 0x30d   : > { %633 = vst.msk [vmem:[%s351_s1 + $0x8] sm:$0xff] %vm456_vm1, %v629_v33 }
 0x30e   : > { %632 = vst.msk [vmem:[%s351_s1] sm:$0xff] %vm456_vm1, %v624_v35 }
 0x30f   : > { %1016 = shalt.err (!%p1013_p6)
}
 0x310   : > { %s1017_s13 = scalar_lea.hbm %s1366_s25, 256  ;;  %s1021_s28 = scalar_lea.hbm %s1419_s7, 512 }
 0x311   : > { %p1018_p8 = scmp.ne.s32.totalorder %s1366_s25, %s1017_s13  ;;  %p1022_p4 = scmp.lt.u32.totalorder %s1366_s25, %s1419_s7 }
 0x312   : > { %p1023_p11 = scmp.lt.u32.totalorder %s1021_s28, %s1017_s13  ;;  %p1025_p3 = scmp.lt.u32.totalorder %s1017_s13, %s1366_s25 }
 0x313   : > { %p1019_p10 = pnand %p1018_p8, %p1224_p12 }
 0x314   : > { %p1024_p13 = por %p1023_p11, %p1022_p4 }
 0x315   : > { %p1020_p0 = pneg %p1019_p10 }
 0x316   : > { %p1026_p7 = por %p1025_p3, %p1024_p13 }
 0x318   : > { %p1027_p9 = pnand %p1026_p7, %p1020_p0 }
 0x31a   : > { %1030 = shalt.err (!%p1027_p9)
}
 0x31b   : > { %s1085_s16 = smov 128   ;;  %s1086_s1 = smov 8  }
 0x31c   : > { %857 = dma.vmem_to_hbm [thread:$0]  (%p1224_p12), %s1361_s24, 256, %s1366_s25, %s635_s23, %s1085_s16, %s1085_s16, %s1086_s1  }
 0x31d PF: > { %s663_s18 = sand.u32 1, %s1065_s26   ;;  %p1450_p1 = scmp.ne.s32.totalorder %s1434_s9, 0 }
 0x31e   : > { %p1451_p5 = scmp.ge.s32.totalorder %s1077_s29, 2  ;;  %s664_s10 = scalar_lea.sflag [#allocation5], %s663_s18 }
 0x320   : > { %p871_p2 = pnand %p1451_p5, %p1450_p1 }
 0x322   : > { %1060 = dma.done.wait (!%p871_p2), %s664_s10, 256  }
 0x323   : > { %1062 = vsyncadd (!%p871_p2), %s664_s10, 4294967040  ;;  %s1452_s29 = sld [smem:[#allocation15_spill]]  ;;  %s1453_s22 = sld [smem:[#allocation14_spill]] }
 0x324   : > { %s1454_s28 = sld [smem:[#allocation16_spill]]  ;;  %s1455_s26 = smov %s1069_s27 }
 0x329   : > { %p24_p6 = scmp.ge.s32.totalorder %s1452_s29, 4   ;;  %s1456_s27 = smov %s1453_s22 }
 0x32b   :  { %26 = sbr.rel (!%p24_p6) target bundleno = 11 (0xb), region = 110 }
 0x332   :  { %669 = vsyncpa [#allocation4], 1 }
 0x333   :  { %671 = vsyncpa [#allocation4 + $0x1], 1 }
 0x334   :  { %672 = vsyncpa [#allocation7], 1 }
 0x335   :  { %674 = vsyncpa [#allocation7 + $0x1], 1 }
 0x336   :  { %675 = vsyncpa [#allocation5], 1 }
 0x337   :  { %677 = vsyncpa [#allocation5 + $0x1], 1 }

</bundles_post_ra>
